<compile_context>
chip_gen: v7x
topology: tpu7x:2x2x1
jax: 0.10.0
libtpu: 0.0.40
codegen_flags: <defaults>
</compile_context>

<pallas_src>
import jax
import jax.numpy as jnp
from jax.experimental import pallas as pl
from jax.experimental.pallas import tpu as pltpu


def _round_up(x, m):
    return (x + m - 1) // m * m


def _cdiv(a, b):
    return (a + b - 1) // b


def _outconv_kernel(x_ref, w_ref, b_ref, o_ref):
    # x_ref: (C_in,  TILE_HW)  lane-dense pixel tile
    # w_ref: (C_out, C_in)     full weight matrix (resident, constant index_map)
    # b_ref: (C_out, 1)        f32 bias column (broadcast over lanes)
    # o_ref: (C_out, TILE_HW)  lane-dense output tile
    acc = jnp.dot(w_ref[...], x_ref[...], preferred_element_type=jnp.float32)
    o_ref[...] = (acc + b_ref[...]).astype(o_ref.dtype)


def _vmem_capacity_bytes():
    """Physical VMEM of the current TPU generation (fallback: v7x's 64 MiB)."""
    try:
        return int(pltpu.get_tpu_info().vmem_capacity_bytes)
    except Exception:  # query unavailable -> assume the most constrained chip
        return 64 << 20


def _choose_tile_hw(n, hw, c_in, c_out, itemsize, stream_budget_bytes,
                    max_tile_hw, min_grid_steps):
    """Pick the lane-tile width (always a multiple of 128)."""
    bytes_per_lane = 2 * (c_in + c_out) * itemsize        # double-buffered x + out
    tile_by_vmem = max(128, (stream_budget_bytes // bytes_per_lane) // 128 * 128)
    tile_hw = min(max_tile_hw, _round_up(hw, 128), tile_by_vmem)

    # Guarantee enough total grid steps so both v7x TensorCores (and the
    # software pipeline) get work even for single-image / small-HW shapes.
    if n * _cdiv(hw, tile_hw) < min_grid_steps and hw > 128:
        want_tiles = _cdiv(min_grid_steps, n)
        tile_hw = min(tile_hw,
                      max(128, _round_up(_cdiv(hw, want_tiles), 128)))
    return tile_hw


def outconv_forward(x_nchw, weight, bias, *, max_tile_hw=16384):
    """1x1 conv forward (PyTorch OutConv semantics).

    x_nchw: (N, C_in, H, W); weight: (C_out, C_in, 1, 1); bias: (C_out,).
    Returns (N, C_out, H, W) in x's dtype."""
    n, c_in, h, w = x_nchw.shape
    c_out = weight.shape[0]
    hw = h * w
    itemsize = jnp.dtype(x_nchw.dtype).itemsize

    # NCHW -> (N, C_in, H*W): pure reshape — no transpose, no padding pass.
    x_3d = x_nchw.reshape(n, c_in, hw)
    # Weight in the activation dtype keeps the native bf16 MXU path when x is
    # bf16; accumulation stays f32 in the kernel. Bias stays f32 (tiny).
    w_mat = weight.reshape(c_out, c_in).astype(x_nchw.dtype)
    b_col = bias.reshape(c_out, 1).astype(jnp.float32)

    # Generation-aware VMEM budget: never request more than ~75% of physical
    # VMEM (48 MiB on v7x; ~96 MiB on v5e/v6e).
    vmem_cap = int(0.75 * _vmem_capacity_bytes())
    resident = 2 * (c_out * c_in * itemsize + c_out * 4)   # W + b (double-buffered)
    headroom = 4 << 20
    stream_budget = max(1 << 20, vmem_cap - resident - headroom)

    tile_hw = _choose_tile_hw(n, hw, c_in, c_out, itemsize, stream_budget,
                              max_tile_hw, min_grid_steps=4)
    grid = (n, _cdiv(hw, tile_hw))   # ragged last HW tile handled by Pallas masking

    # Exact scoped-VMEM request (+ headroom), clamped to the physical cap.
    needed = 2 * (c_in + c_out) * tile_hw * itemsize + resident
    vmem_limit = int(min(vmem_cap, max(needed + headroom, 32 << 20)))

    cost = pl.CostEstimate(
        flops=2 * n * hw * c_in * c_out,
        transcendentals=0,
        bytes_accessed=n * hw * (c_in + c_out) * itemsize
        + c_out * c_in * itemsize + c_out * 4,
    )

    out_3d = pl.pallas_call(
        _outconv_kernel,
        out_shape=jax.ShapeDtypeStruct((n, c_out, hw), x_nchw.dtype),
        grid_spec=pltpu.PrefetchScalarGridSpec(
            num_scalar_prefetch=0,
            grid=grid,
            in_specs=[
                # x tile: squeeze batch, channels on sublanes, pixels on lanes.
                pl.BlockSpec((None, c_in, tile_hw), lambda b, i: (b, 0, i)),
                # full weight matrix, resident (constant block index -> one DMA).
                pl.BlockSpec((c_out, c_in), lambda b, i: (0, 0)),
                # bias column, resident.
                pl.BlockSpec((c_out, 1), lambda b, i: (0, 0)),
            ],
            out_specs=pl.BlockSpec((None, c_out, tile_hw), lambda b, i: (b, 0, i)),
        ),
        compiler_params=pltpu.CompilerParams(
            dimension_semantics=("parallel", "parallel"),
            vmem_limit_bytes=vmem_limit,
        ),
        cost_estimate=cost,
    )(x_3d, w_mat, b_col)

    # (N, C_out, H*W) -> NCHW: pure reshape, nothing to slice off.
    return out_3d.reshape(n, c_out, h, w)


def init_outconv_params(key, in_channels, out_channels, dtype=jnp.float32):
    """Deterministic init mimicking nn.Conv2d defaults (uniform +-1/sqrt(fan_in))."""
    kw, kb = jax.random.split(key)
    fan_in = in_channels * 1 * 1
    bound = 1.0 / jnp.sqrt(fan_in)
    weight = jax.random.uniform(
        kw, (out_channels, in_channels, 1, 1), dtype, -bound, bound)
    bias = jax.random.uniform(kb, (out_channels,), dtype, -bound, bound)
    return weight, bias


def _ref_outconv(x, weight, bias):
    w = weight.reshape(weight.shape[0], weight.shape[1])
    return jnp.einsum("nchw,oc->nohw", x, w) + bias[None, :, None, None]


if __name__ == "__main__":
    key = jax.random.PRNGKey(0)
    k_x, k_p = jax.random.split(key)

    batch, in_channels, out_channels, spatial = 2, 4, 3, 16
    x = jax.random.normal(k_x, (batch, in_channels, spatial, spatial),
                          dtype=jnp.float32)
    weight, bias = init_outconv_params(k_p, in_channels, out_channels)

    out = jax.block_until_ready(outconv_forward(x, weight, bias))
    ref = _ref_outconv(x, weight, bias)
    assert out.shape == (batch, out_channels, spatial, spatial)
    assert jnp.allclose(out, ref, atol=1e-5, rtol=1e-5)

    # Ragged H*W (not a multiple of 128): exercises the masked last lane tile
    # (no jnp.pad / slice in the wrapper anymore).
    x2 = jax.random.normal(k_x, (batch, in_channels, 10, 10), dtype=jnp.float32)
    out2 = jax.block_until_ready(outconv_forward(x2, weight, bias))
    assert jnp.allclose(out2, _ref_outconv(x2, weight, bias), atol=1e-5, rtol=1e-5)

    # bf16 activations: exercises the native bf16 MXU path (f32 accumulation).
    x3 = x.astype(jnp.bfloat16)
    out3 = jax.block_until_ready(outconv_forward(x3, weight, bias))
    ref3 = _ref_outconv(x3.astype(jnp.float32), weight, bias)
    assert out3.dtype == jnp.bfloat16
    assert jnp.allclose(out3.astype(jnp.float32), ref3, atol=1e-1, rtol=1e-1)

    print("KERNEL_OK")
</pallas_src>

<mosaic_0001>
module attributes {stable_mosaic.version = 11 : i64} {
  func.func @_outconv_kernel(%arg0: i32, %arg1: i32, %arg2: memref<1x4x128xf32, #tpu.memory_space<vmem>>, %arg3: memref<3x4xf32, #tpu.memory_space<vmem>>, %arg4: memref<3x1xf32, #tpu.memory_space<vmem>>, %arg5: memref<1x3x128xf32, #tpu.memory_space<vmem>>) attributes {dimension_semantics = [#tpu.dimension_semantics<parallel>, #tpu.dimension_semantics<parallel>], iteration_bounds = array<i64: 2, 2>, scalar_prefetch = 0 : i64, scratch_operands = 0 : i64, tpu.core_type = #tpu.core_type<tc>, window_params = [{transform_indices = @transform_0, window_bounds = array<i64: 1, 4, 128>}, {pipeline_mode = #tpu.pipeline_mode<synchronous>, transform_indices = @transform_1, window_bounds = array<i64: 3, 4>}, {pipeline_mode = #tpu.pipeline_mode<synchronous>, transform_indices = @transform_2, window_bounds = array<i64: 3, 1>}, {transform_indices = @transform_3, window_bounds = array<i64: 1, 3, 128>}]} {
    %c0 = arith.constant 0 : index
    %c0_0 = arith.constant 0 : index
    %0 = vector.load %arg3[%c0, %c0_0] : memref<3x4xf32, #tpu.memory_space<vmem>>, vector<3x4xf32>
    %c0_1 = arith.constant 0 : index
    %c0_2 = arith.constant 0 : index
    %c0_3 = arith.constant 0 : index
    %1 = vector.load %arg2[%c0_1, %c0_2, %c0_3] : memref<1x4x128xf32, #tpu.memory_space<vmem>>, vector<1x4x128xf32>
    %2 = vector.shape_cast %1 : vector<1x4x128xf32> to vector<4x128xf32>
    %cst = arith.constant dense<0.000000e+00> : vector<3x128xf32>
    %3 = tpu.matmul %0, %2, %cst {dimension_numbers = #tpu.dot_dimension_numbers<[1], [0], [0], [1], [0, 0, 1, 1], [], []>} : vector<3x4xf32>, vector<4x128xf32>, vector<3x128xf32> -> vector<3x128xf32>
    %c0_4 = arith.constant 0 : index
    %c0_5 = arith.constant 0 : index
    %4 = vector.load %arg4[%c0_4, %c0_5] : memref<3x1xf32, #tpu.memory_space<vmem>>, vector<3x1xf32>
    %5 = vector.broadcast %4 : vector<3x1xf32> to vector<3x128xf32>
    %6 = arith.addf %3, %5 : vector<3x128xf32>
    %c0_6 = arith.constant 0 : index
    %c0_7 = arith.constant 0 : index
    %c0_8 = arith.constant 0 : index
    %7 = vector.load %arg5[%c0_6, %c0_7, %c0_8] : memref<1x3x128xf32, #tpu.memory_space<vmem>>, vector<1x3x128xf32>
    %8 = vector.shape_cast %7 : vector<1x3x128xf32> to vector<3x128xf32>
    %9 = vector.shape_cast %6 : vector<3x128xf32> to vector<1x3x128xf32>
    tpu.vector_store %arg5[%c0_6, %c0_7, %c0_8], %9 {strides = array<i32>} : memref<1x3x128xf32, #tpu.memory_space<vmem>>, vector<1x3x128xf32>,
    return
  }
  func.func @transform_0(%arg0: i32, %arg1: i32) -> (i32, i32, i32) {
    %c0_i32 = arith.constant 0 : i32
    %c0_i32_0 = arith.constant 0 : i32
    return %arg0, %c0_i32, %arg1 : i32, i32, i32
  }
  func.func @transform_1(%arg0: i32, %arg1: i32) -> (i32, i32) {
    %c0_i32 = arith.constant 0 : i32
    %c0_i32_0 = arith.constant 0 : i32
    %c0_i32_1 = arith.constant 0 : i32
    return %c0_i32, %c0_i32_0 : i32, i32
  }
  func.func @transform_2(%arg0: i32, %arg1: i32) -> (i32, i32) {
    %c0_i32 = arith.constant 0 : i32
    %c0_i32_0 = arith.constant 0 : i32
    %c0_i32_1 = arith.constant 0 : i32
    return %c0_i32, %c0_i32_0 : i32, i32
  }
  func.func @transform_3(%arg0: i32, %arg1: i32) -> (i32, i32, i32) {
    %c0_i32 = arith.constant 0 : i32
    %c0_i32_0 = arith.constant 0 : i32
    return %arg0, %c0_i32, %arg1 : i32, i32, i32
  }
}

</mosaic_0001>

<bundles_post_ra>
// kernel: tpu_custom_call.1
= control target key start
LH: loop header
LB: loop body
LE: loop exit
PB: predicated region body
PF: predicated region fallthrough
CT: control target
= control target key end

     0   :  { %8 = vsyncpa [#allocation3], 0  ;;  %s770_s0 = inlined_call_operand.hbm [shape: f32[2,4,256], index: 0, kind: input, shape index: {}]   ;;  %s771_s1 = inlined_call_operand.vmem [shape: f32[3,4], index: 1, kind: input, shape index: {}]   ;;  %s772_s2 = inlined_call_operand.vmem [shape: f32[3,1], index: 2, kind: input, shape index: {}]   ;;  %s773_s3 = inlined_call_operand.vmem [shape: f32[2,3,256], index: 3, kind: output, shape index: {}]  }
   0x1   :  { %10 = vsyncpa [#allocation3 + $0x1], 0  ;;  %s612_s12 = smov 0   ;;  %s614_s13 = smov 0  }
   0x2   :  { %s616_s14 = smov 0   ;;  %s618_s15 = smov 0  }
   0x3   :  { %s620_s16 = smov 0   ;;  %s622_s17 = smov 0  }
   0x4   :  { %s624_s18 = smov 0   ;;  %s626_s19 = smov 0  }
   0x5 LB: > { %s393_s20 = sadd.s32 4294967295, %s586_s19   ;;  %s25_s21 = sadd.s32 1, %s578_s17  ;;  %s586_s19 = sphi %s626_s19, %s16_s19   ;;  %s582_s18 = sphi %s624_s18, %s785_s18   ;;  %s578_s17 = sphi %s622_s17, %s784_s17   ;;  %s574_s16 = sphi %s620_s16, %s783_s16   ;;  %s570_s15 = sphi %s618_s15, %s782_s15   ;;  %s566_s14 = sphi %s616_s14, %s781_s14   ;;  %s562_s13 = sphi %s614_s13, %s780_s13   ;;  %s558_s12 = sphi %s612_s12, %s779_s12  }
   0x6   : > { %p26_p0 = scmp.ge.s32.totalorder %s25_s21, 2  ;;  %s28_s22 = sadd.s32 1, %s582_s18 }
   0x7   : > { %s37_s23 = sadd.s32 1, %s566_s14  ;;  %p44_p1 = scmp.ne.s32.totalorder %s566_s14, %s562_s13 }
   0x8   : > { %s787_s21 = smov (%p26_p0, %s25_s21), 0  ;;  %s789_s22 = smov (!%p26_p0, %s28_s22), %s582_s18 }
   0x9   : > { %s33_s24 = ssub.s32 %s578_s17, %s787_s21  ;;  %p45_p2 = scmp.eq.s32.totalorder %s586_s19, 0 }
   0xa   : > { %p30_p3 = scmp.ge.s32.totalorder %s789_s22, 2  ;;  %p50_p4 = scmp.ne.s32.totalorder %s562_s13, %s558_s12 }
   0xb   : > { %p663_p5 = por %p45_p2, %p44_p1  ;;  %p51_p6 = scmp.eq.s32.totalorder %s393_s20, 0 }
   0xc   : > { %s791_s22 = smov (%p30_p3, %s789_s22), 0  ;;  %p421_p8 = scmp.lt.s32.totalorder %s586_s19, 4 }
   0xd   : > { %p669_p7 = por %p51_p6, %p50_p4  ;;  %s32_s27 = ssub.s32 %s582_s18, %s791_s22 }
   0xe   : > { %s34_s28 = sor.u32 %s33_s24, %s32_s27  ;;  %s150_s29 = sand.u32 1, %s566_s14  }
   0xf   : > { %p35_p9 = scmp.eq.s32.totalorder %s34_s28, 0  ;;  %s397_s30 = sshll.u32 %s150_s29, 2 }
  0x10   : > { %s398_s4 = sshll.u32 %s582_s18, 1  ;;  %s154_s8 = scalar_lea.vmem [#allocation2], %s397_s30 }
  0x11   : > { %s679_s5 = scalar_select %p35_p9, %s566_s14, %s37_s23  }
  0x12   : > { %s159_s6 = sadd.s32 %s578_s17, %s398_s4  ;;  %s163_s9 = sshll.u32 %s154_s8, 4  ;;  %s687_s9 = int_to_ptr.vmem [resolvable:$true] %s163_s9 }
  0x13   : > { %s399_s7 = sshll.u32 %s159_s6, 6  ;;  %p693_p10 = pnand %p421_p8, %p663_p5 }
  0x14   : > { %s685_s12 = scalar_lea.hbm %s770_s0, %s399_s7  ;;  %s151_s23 = scalar_lea.sflag [#allocation3], %s150_s29 }
  0x15   : > { %s490_s24 = scalar_lea.hbm %s685_s12, 64  ;;  %p492_p0 = pneg %p693_p10 }
  0x16   : > { %p491_p13 = scmp.ne.s32.totalorder %s685_s12, %s490_s24  ;;  %s495_s28 = scalar_lea.hbm %s770_s0, 256 }
  0x17   : > { %p496_p3 = scmp.lt.u32.totalorder %s685_s12, %s770_s0  ;;  %p497_p4 = scmp.lt.u32.totalorder %s495_s28, %s490_s24 }
  0x18   : > { %p493_p1 = pnand %p492_p0, %p491_p13  ;;  %p499_p6 = scmp.lt.u32.totalorder %s490_s24, %s685_s12 }
  0x19   : > { %p498_p5 = por %p497_p4, %p496_p3 }
  0x1a   : > { %p494_p2 = pneg %p493_p1 }
  0x1b   : > { %p500_p8 = por %p499_p6, %p498_p5 }
  0x1d   : > { %p501_p9 = pnand %p500_p8, %p494_p2 }
  0x1f   : > { %504 = shalt.err (!%p501_p9)
}
  0x20   : > { %s505_s29 = scalar_lea.vmem %s687_s9, 64  ;;  %s588_s6 = smov [#allocation2]  }
  0x21   : > { %p506_p13 = scmp.ne.s32.totalorder %s687_s9, %s505_s29  ;;  %s510_s7 = sshll.u32 %s588_s6, 4  ;;  %s511_s7 = int_to_ptr.vmem [resolvable:$false] %s510_s7 }
  0x22   : > { %s512_s8 = scalar_lea.vmem %s511_s7, 128  ;;  %p513_p12 = scmp.lt.s32.totalorder %s687_s9, %s511_s7 }
  0x23   : > { %p508_p1 = pnand %p506_p13, %p492_p0  ;;  %p514_p3 = scmp.lt.s32.totalorder %s512_s8, %s505_s29 }
  0x25   : > { %p509_p11 = pneg %p508_p1  ;;  %p515_p4 = por %p514_p3, %p513_p12 }
  0x27   : > { %p516_p5 = pnand %p515_p4, %p509_p11 }
  0x29   : > { %519 = shalt.err (!%p516_p5)
}
  0x2a   : > { %420 = dma.hbm_to_vmem [thread:$0]  (!%p693_p10), %s685_s12, 64, %s687_s9, %s151_s23  }
  0x2b   : > { %p777_p2 = scmp.lt.s32.totalorder %s586_s19, 5  ;;  %p778_p6 = scmp.ge.s32.totalorder %s586_s19, 1 }
  0x2d   : > { %p169_p0 = pnand %p778_p6, %p777_p2 }
  0x2e   : > { %s174_s10 = sand.u32 (!%p169_p0), 1, %s562_s13  }
  0x2f   : > { %172 = sbr.rel (%p169_p0) target bundleno = 273 (0x111), region = 32  ;;  %s401_s11 = sshll.u32 (!%p169_p0), %s174_s10, 2 }
  0x30   : > { %s175_s24 = scalar_lea.sflag (!%p169_p0), [#allocation3], %s174_s10  ;;  %s178_s27 = scalar_lea.vmem (!%p169_p0), [#allocation2], %s401_s11 }
  0x36   : > { %553 = dma.done.wait (%p669_p7), %s175_s24, 64  }
  0x37   : > { %555 = vsyncadd (%p669_p7), %s175_s24, 4294967232  ;;  %v589_v0 = vmov 0.0   ;;  %vm590_vm0 = vmmov 0   ;;  %v591_v1 = vmov 0   ;;  %vm224_vm1 = vcmask 1043456   ;;  %p204_p7 = scmp.lt.s32.totalorder %s574_s16, 1 }
  0x38   : > { %410 = vmatprep.subr.mxu0 %v589_v0  ;;  %412 = vmatprep.mubr.msk.f32.mxu0 %vm590_vm0, %v589_v0  ;;  %vm220_vm2 = vcmask 31744   ;;  %v213_v2 = vld [vmem:[%s178_s27] sm:$0xf]  ;;  %p206_p10 = scmp.lt.s32.totalorder %s570_s15, 1 }
  0x39   : > { %489 = vset.pattern.permute.xlu0 %v591_v1  ;;  %v212_v3 = vld [vmem:[%s771_s1] sm:$0x7]  ;;  %411 = vmatpush3.msk.msra.mxu0 %vm224_vm1, %v213_v2  ;;  %s793_s16 = smov (!%p204_p7, %s574_s16), 1 }
  0x3a   : > { %v214_v4 = vld [vmem:[%s772_s2] sm:$0x7]  ;;  %413 = vmatmul.mubr.msk.f32.vlgmr.msra.gmra.mrb[0].mxu0 %vm220_vm2, %v212_v3  ;;  %s795_s15 = smov (!%p206_p10, %s570_s15), 1  ;;  %s402_s23 = sshll.u32 %s793_s16, 1 }
  0x3b   : > { %217 = vperm.xlu0 %489, %v214_v4   ;;  %s209_s25 = sadd.s32 %s402_s23, %s795_s15 }
  0x3c   : > { %s403_s28 = sshll.u32 %s209_s25, 2 }
  0x3d   : > { %s211_s29 = scalar_lea.vmem %s773_s3, %s403_s28 }
  0xba   : > { %v218_v5 = vpop.permute.xlu0 %217 }
 0x10d   : > { %v294_v6 = vpop.f32.mrb[0].mxu0 }
 0x10e   : > { %v295_v7 = vadd.f32 %v294_v6, %v218_v5  ;;  %v414_v8 = vpop.f32.mrb[1].mxu0 }
 0x110   : > { %298 = vst [vmem:[%s211_s29] sm:$0x7] %v295_v7 }
 0x111 PF: > { %s16_s19 = sadd.s32 1, %s586_s19   ;;  %s779_s12 = smov %s562_s13 }
 0x112   : > { %p13_p11 = scmp.ge.s32.totalorder %s16_s19, 6   ;;  %s780_s13 = smov %s566_s14 }
 0x113   : > { %s781_s14 = smov %s679_s5  ;;  %s782_s15 = smov %s578_s17 }
 0x114   : > { %s783_s16 = smov %s582_s18  ;;  %s784_s17 = smov %s787_s21 }
 0x115   : > { %s785_s18 = smov %s791_s22  ;;  %15 = sbr.rel (!%p13_p11) target bundleno = 5 (0x5), region = 72 }
 0x11c   :  { %326 = vsyncpa [#allocation3], 1 }
 0x11d   :  { %328 = vsyncpa [#allocation3 + $0x1], 1 }

</bundles_post_ra>
